<compile_context>
chip_gen: v7x
topology: tpu7x:2x2x1
jax: 0.10.0
libtpu: 0.0.40
codegen_flags: <defaults>
</compile_context>

<pallas_src>
import jax
import jax.numpy as jnp
from jax.experimental import pallas as pl
from jax.experimental.pallas import tpu as pltpu


def _round_up(a, b):
    return (a + b - 1) // b * b


def _largest_divisor_leq(n, cap):
    best = 1
    for d in range(1, n + 1):
        if n % d == 0 and d <= cap:
            best = d
    return best


def _default_tile_n():
    # 256-wide MXU on v6e / v7x, 128-wide on v5e and older generations.
    try:
        kind = jax.devices()[0].device_kind.lower()
    except Exception:
        return 128
    if "v6" in kind or "v7" in kind:
        return 256
    return 128


def _conv_stats_kernel(p_ref, w_ref, conv_ref, stats_ref, acc_ref):
    """Tiled MXU matmul (K-accumulated) + per-M-tile partial BatchNorm stats.

    p_ref:     (TILE_M, TILE_K)   im2col patch block (compute dtype)
    w_ref:     (TILE_K, TILE_N)   folded conv weight block (compute dtype)
    conv_ref:  (TILE_M, TILE_N)   raw conv output tile (compute dtype)
    stats_ref: (1, 2, TILE_N)     row 0 = per-channel sum, row 1 = sum of squares
    acc_ref:   (TILE_M, TILE_N)   f32 VMEM accumulator scratch
    """
    k = pl.program_id(2)

    @pl.when(k == 0)
    def _():
        acc_ref[...] = jnp.zeros_like(acc_ref)

    acc_ref[...] += jnp.dot(p_ref[...], w_ref[...],
                            preferred_element_type=jnp.float32)

    @pl.when(k == pl.num_programs(2) - 1)
    def _():
        acc = acc_ref[...]
        conv_ref[...] = acc.astype(conv_ref.dtype)
        s = jnp.sum(acc, axis=0, keepdims=True)          # (1, TILE_N)
        ss = jnp.sum(acc * acc, axis=0, keepdims=True)   # (1, TILE_N)
        stats_ref[0, :, :] = jnp.concatenate([s, ss], axis=0)


def _bn_relu6_kernel(conv_ref, scale_ref, shift_ref, o_ref):
    """Fused BatchNorm affine (precomputed scale/shift) + ReLU6 on one block."""
    y = conv_ref[...].astype(jnp.float32) * scale_ref[...] + shift_ref[...]
    o_ref[...] = jnp.clip(y, 0.0, 6.0).astype(o_ref.dtype)


def conv_bn_relu6(x_nchw, weight_oihw, gamma, beta, *, stride=1, eps=1e-5,
                  tile_m=512, tile_n=None, max_tile_k=2048,
                  compute_dtype=jnp.bfloat16):
    """Forward pass of conv_BNRelu (groups=1 only), NCHW in / NCHW out."""
    N, Cin, H, W = x_nchw.shape
    Cout, Cin_w, KH, KW = weight_oihw.shape
    assert Cin_w == Cin, "groups != 1 not supported"
    if tile_n is None:
        tile_n = _default_tile_n()
    assert tile_m % 8 == 0 and tile_n % 128 == 0 and max_tile_k % 128 == 0
    pad = (KH - 1) // 2  # PyTorch module convention: padding = (kernel_size-1)//2

    # NCHW -> NHWC, spatial zero padding.
    x = jnp.transpose(x_nchw, (0, 2, 3, 1))
    xp = jnp.pad(x, ((0, 0), (pad, pad), (pad, pad), (0, 0)))
    Ho = (H + 2 * pad - KH) // stride + 1
    Wo = (W + 2 * pad - KW) // stride + 1

    # im2col, fused into the surrounding jit; the kernel streams it in tiles.
    taps = []
    for kh in range(KH):
        for kw in range(KW):
            taps.append(xp[:, kh:kh + Ho * stride:stride,
                           kw:kw + Wo * stride:stride, :])
    patches = jnp.stack(taps, axis=3).reshape(N * Ho * Wo, KH * KW * Cin)

    M, K = patches.shape
    tm, tn = tile_m, tile_n

    # K tiling: pick num_k so that each K tile is <= max_tile_k and a multiple
    # of 128 (lane dim of the patch block / sublane dim of the weight block).
    num_k = max(1, -(-K // max_tile_k))
    tk = _round_up(-(-K // num_k), 128)
    Kp = tk * num_k

    Mp = _round_up(M, tm)
    Cout_p = _round_up(Cout, tn)
    num_m = Mp // tm
    num_n = Cout_p // tn

    isz = jnp.dtype(compute_dtype).itemsize
    conv_isz = isz                       # conv intermediate stored in compute dtype
    out_isz = jnp.dtype(x_nchw.dtype).itemsize

    patches = jnp.pad(patches.astype(compute_dtype),
                      ((0, Mp - M), (0, Kp - K)))
    # OIHW -> (KH, KW, Cin, Cout) -> (K, Cout), matching the patch tap ordering.
    w2 = jnp.transpose(weight_oihw, (2, 3, 1, 0)).reshape(K, Cout)
    w2 = jnp.pad(w2.astype(compute_dtype), ((0, Kp - K), (0, Cout_p - Cout)))

    # Grid: M tiles outer, Cout tiles middle, K tiles inner ("arbitrary").
    # With num_k == 1 the patch block index is constant across the inner Cout
    # loop, so the pipeline fetches each patch block exactly once.
    grid = (num_m, num_n, num_k)

    patch_reads = Mp * Kp * isz * (1 if num_k == 1 else num_n)
    cost = pl.CostEstimate(
        flops=2 * Mp * Kp * Cout_p,
        transcendentals=0,
        bytes_accessed=(patch_reads
                        + num_m * Kp * Cout_p * isz
                        + Mp * Cout_p * conv_isz
                        + num_m * 2 * Cout_p * 4),
    )

    # Explicit VMEM budget: double-buffered inputs/outputs + accumulator + slack.
    vmem1 = (2 * (tm * tk * isz + tk * tn * isz + tm * tn * conv_isz
                  + 2 * tn * 4)
             + tm * tn * 4 + (8 << 20))
    vmem1 = min(vmem1, 64 << 20)

    # ---- Pass 1: tiled MXU matmul + per-M-tile partial BN statistics --------
    conv_flat, stats = pl.pallas_call(
        _conv_stats_kernel,
        out_shape=(jax.ShapeDtypeStruct((Mp, Cout_p), compute_dtype),
                   jax.ShapeDtypeStruct((num_m, 2, Cout_p), jnp.float32)),
        grid=grid,
        in_specs=[
            pl.BlockSpec((tm, tk), lambda i, j, k: (i, k)),
            pl.BlockSpec((tk, tn), lambda i, j, k: (k, j)),
        ],
        out_specs=(
            pl.BlockSpec((tm, tn), lambda i, j, k: (i, j)),
            pl.BlockSpec((1, 2, tn), lambda i, j, k: (i, 0, j)),
        ),
        scratch_shapes=[pltpu.VMEM((tm, tn), jnp.float32)],
        compiler_params=pltpu.CompilerParams(
            dimension_semantics=("parallel", "parallel", "arbitrary"),
            vmem_limit_bytes=vmem1),
        cost_estimate=cost,
    )(patches, w2)

    # ---- Tiny JAX reduction: fold batch stats into fused scale / shift ------
    # BatchNorm2d training-mode semantics: batch statistics, biased variance.
    # Padded M rows are all-zero conv outputs, so dividing the accumulated sums
    # by the true count keeps the statistics exact.
    count = jnp.float32(M)
    sums = jnp.sum(stats[:, 0, :], axis=0)      # (Cout_p,) f32
    sumsqs = jnp.sum(stats[:, 1, :], axis=0)    # (Cout_p,) f32
    mean = sums / count
    var = jnp.maximum(sumsqs / count - mean * mean, 0.0)
    inv_std = jax.lax.rsqrt(var + eps)
    gamma_p = jnp.pad(gamma.astype(jnp.float32).reshape(-1), (0, Cout_p - Cout))
    beta_p = jnp.pad(beta.astype(jnp.float32).reshape(-1), (0, Cout_p - Cout))
    scale = (gamma_p * inv_std).reshape(1, Cout_p)
    shift = (beta_p - mean * gamma_p * inv_std).reshape(1, Cout_p)

    # ---- Pass 2: big lane-dense fused scale/shift + ReLU6 epilogue ----------
    # 1-D grid over M with full-Cout_p-wide blocks; grow the M block (multiple
    # of tm that divides Mp) until the f32 output block is ~4 MiB.
    g_cap = max(1, (4 << 20) // max(1, tm * Cout_p * 4))
    tm2 = tm * _largest_divisor_leq(num_m, g_cap)
    vmem2 = 2 * (tm2 * Cout_p * (conv_isz + out_isz) + 2 * Cout_p * 4) + (8 << 20)
    vmem2 = min(vmem2, 64 << 20)

    out_flat = pl.pallas_call(
        _bn_relu6_kernel,
        out_shape=jax.ShapeDtypeStruct((Mp, Cout_p), x_nchw.dtype),
        grid=(Mp // tm2,),
        in_specs=[
            pl.BlockSpec((tm2, Cout_p), lambda i: (i, 0)),
            pl.BlockSpec((1, Cout_p), lambda i: (0, 0)),
            pl.BlockSpec((1, Cout_p), lambda i: (0, 0)),
        ],
        out_specs=pl.BlockSpec((tm2, Cout_p), lambda i: (i, 0)),
        compiler_params=pltpu.CompilerParams(
            dimension_semantics=("parallel",),
            vmem_limit_bytes=vmem2),
    )(conv_flat, scale, shift)

    out = out_flat[:M, :Cout].reshape(N, Ho, Wo, Cout)
    return jnp.transpose(out, (0, 3, 1, 2))


def _reference(x_nchw, weight_oihw, gamma, beta, stride=1, eps=1e-5):
    KH = weight_oihw.shape[2]
    pad = (KH - 1) // 2
    conv = jax.lax.conv_general_dilated(
        x_nchw, weight_oihw, window_strides=(stride, stride),
        padding=((pad, pad), (pad, pad)),
        dimension_numbers=("NCHW", "OIHW", "NCHW"))
    mean = jnp.mean(conv, axis=(0, 2, 3), keepdims=True)
    var = jnp.mean((conv - mean) ** 2, axis=(0, 2, 3), keepdims=True)
    y = (conv - mean) * jax.lax.rsqrt(var + eps)
    y = y * gamma.reshape(1, -1, 1, 1) + beta.reshape(1, -1, 1, 1)
    return jnp.clip(y, 0.0, 6.0)


if __name__ == "__main__":
    key = jax.random.PRNGKey(0)
    k_x, k_w, k_g, k_b = jax.random.split(key, 4)

    N, Cin, H, W = 2, 4, 16, 16
    Cout, KH, KW = 8, 3, 3

    x = jax.random.normal(k_x, (N, Cin, H, W), dtype=jnp.float32)
    # Conv2d has bias=False in the module; synthetic BN affine parameters.
    weight = jax.random.normal(k_w, (Cout, Cin, KH, KW), dtype=jnp.float32) * 0.1
    gamma = 1.0 + 0.1 * jax.random.normal(k_g, (Cout,), dtype=jnp.float32)
    beta = 0.1 * jax.random.normal(k_b, (Cout,), dtype=jnp.float32)

    ref = _reference(x, weight, gamma, beta)

    # Default path: bf16 MXU inputs + bf16 conv intermediate, f32 accumulation.
    # tile_m=128 so this small test runs a multi-M-tile grid and exercises the
    # partial-stats combine; tile_n=128 keeps lane-padding minimal for Cout=8.
    run_bf16 = jax.jit(lambda a, b, c, d: conv_bn_relu6(
        a, b, c, d, tile_m=128, tile_n=128))
    out = jax.block_until_ready(run_bf16(x, weight, gamma, beta))
    assert out.shape == (N, Cout, H, W)
    assert jnp.allclose(out, ref, rtol=3e-2, atol=3e-2), "bf16 path mismatch vs reference"

    # Strict check: f32 matmul inputs and f32 conv intermediate; tile_n picked
    # automatically per TPU generation (256 on v6e/v7x, 128 on v5e).
    run_f32 = jax.jit(lambda a, b, c, d: conv_bn_relu6(
        a, b, c, d, tile_m=128, compute_dtype=jnp.float32))
    out32 = jax.block_until_ready(run_f32(x, weight, gamma, beta))
    assert jnp.allclose(out32, ref, rtol=1e-2, atol=1e-2), "f32 path mismatch vs reference"

    print("KERNEL_OK")
</pallas_src>

<mosaic_0001>
module attributes {stable_mosaic.version = 11 : i64} {
  func.func @_conv_stats_kernel(%arg0: i32, %arg1: i32, %arg2: i32, %arg3: memref<128x128xbf16, #tpu.memory_space<vmem>>, %arg4: memref<128x128xbf16, #tpu.memory_space<vmem>>, %arg5: memref<128x128xbf16, #tpu.memory_space<vmem>>, %arg6: memref<1x2x128xf32, #tpu.memory_space<vmem>>, %arg7: memref<128x128xf32, #tpu.memory_space<vmem>>) attributes {dimension_semantics = [#tpu.dimension_semantics<parallel>, #tpu.dimension_semantics<parallel>, #tpu.dimension_semantics<arbitrary>], iteration_bounds = array<i64: 4, 1, 1>, scalar_prefetch = 0 : i64, scratch_operands = 1 : i64, tpu.core_type = #tpu.core_type<tc>, window_params = [{transform_indices = @transform_0, window_bounds = array<i64: 128, 128>}, {transform_indices = @transform_1, window_bounds = array<i64: 128, 128>}, {transform_indices = @transform_2, window_bounds = array<i64: 128, 128>}, {transform_indices = @transform_3, window_bounds = array<i64: 1, 2, 128>}]} {
    %c0_i32 = arith.constant 0 : i32
    %0 = arith.cmpi eq, %arg2, %c0_i32 : i32
    %1 = arith.extui %0 : i1 to i32
    %c0_i32_0 = arith.constant 0 : i32
    %2 = arith.cmpi ne, %1, %c0_i32_0 : i32
    scf.if %2 {
      %cst_10 = arith.constant 0.000000e+00 : f32
      %12 = vector.broadcast %cst_10 : f32 to vector<128x128xf32>
      %c0_11 = arith.constant 0 : index
      %c0_12 = arith.constant 0 : index
      %13 = vector.load %arg7[%c0_11, %c0_12] : memref<128x128xf32, #tpu.memory_space<vmem>>, vector<128x128xf32>
      tpu.vector_store %arg7[%c0_11, %c0_12], %12 {strides = array<i32>} : memref<128x128xf32, #tpu.memory_space<vmem>>, vector<128x128xf32>,
    } else {
    }
    %c0 = arith.constant 0 : index
    %c0_1 = arith.constant 0 : index
    %3 = vector.load %arg7[%c0, %c0_1] : memref<128x128xf32, #tpu.memory_space<vmem>>, vector<128x128xf32>
    %c0_2 = arith.constant 0 : index
    %c0_3 = arith.constant 0 : index
    %4 = vector.load %arg3[%c0_2, %c0_3] : memref<128x128xbf16, #tpu.memory_space<vmem>>, vector<128x128xbf16>
    %c0_4 = arith.constant 0 : index
    %c0_5 = arith.constant 0 : index
    %5 = vector.load %arg4[%c0_4, %c0_5] : memref<128x128xbf16, #tpu.memory_space<vmem>>, vector<128x128xbf16>
    %cst = arith.constant dense<0.000000e+00> : vector<128x128xf32>
    %6 = tpu.matmul %4, %5, %cst {dimension_numbers = #tpu.dot_dimension_numbers<[1], [0], [0], [1], [0, 0, 1, 1], [], []>} : vector<128x128xbf16>, vector<128x128xbf16>, vector<128x128xf32> -> vector<128x128xf32>
    %7 = arith.addf %3, %6 : vector<128x128xf32>
    %c0_6 = arith.constant 0 : index
    %c0_7 = arith.constant 0 : index
    %8 = vector.load %arg7[%c0_6, %c0_7] : memref<128x128xf32, #tpu.memory_space<vmem>>, vector<128x128xf32>
    tpu.vector_store %arg7[%c0_6, %c0_7], %7 {strides = array<i32>} : memref<128x128xf32, #tpu.memory_space<vmem>>, vector<128x128xf32>,
    %c0_i32_8 = arith.constant 0 : i32
    %9 = arith.cmpi eq, %arg2, %c0_i32_8 : i32
    %10 = arith.extui %9 : i1 to i32
    %c0_i32_9 = arith.constant 0 : i32
    %11 = arith.cmpi ne, %10, %c0_i32_9 : i32
    scf.if %11 {
      %c0_10 = arith.constant 0 : index
      %c0_11 = arith.constant 0 : index
      %12 = vector.load %arg7[%c0_10, %c0_11] : memref<128x128xf32, #tpu.memory_space<vmem>>, vector<128x128xf32>
      %13 = arith.truncf %12 : vector<128x128xf32> to vector<128x128xbf16>
      %c0_12 = arith.constant 0 : index
      %c0_13 = arith.constant 0 : index
      %14 = vector.load %arg5[%c0_12, %c0_13] : memref<128x128xbf16, #tpu.memory_space<vmem>>, vector<128x128xbf16>
      tpu.vector_store %arg5[%c0_12, %c0_13], %13 {strides = array<i32>} : memref<128x128xbf16, #tpu.memory_space<vmem>>, vector<128x128xbf16>,
      %cst_14 = arith.constant dense<0.000000e+00> : vector<128xf32>
      %15 = vector.multi_reduction <add>, %12, %cst_14 [0] : vector<128x128xf32> to vector<128xf32>
      %16 = vector.shape_cast %15 : vector<128xf32> to vector<1x128xf32>
      %17 = arith.mulf %12, %12 : vector<128x128xf32>
      %cst_15 = arith.constant dense<0.000000e+00> : vector<128xf32>
      %18 = vector.multi_reduction <add>, %17, %cst_15 [0] : vector<128x128xf32> to vector<128xf32>
      %19 = vector.shape_cast %18 : vector<128xf32> to vector<1x128xf32>
      %20 = tpu.concatenate %16, %19 in 0 : vector<1x128xf32>, vector<1x128xf32> -> vector<2x128xf32>
      %c0_16 = arith.constant 0 : index
      %c0_17 = arith.constant 0 : index
      %c0_18 = arith.constant 0 : index
      %21 = vector.load %arg6[%c0_16, %c0_17, %c0_18] : memref<1x2x128xf32, #tpu.memory_space<vmem>>, vector<1x2x128xf32>
      %22 = vector.shape_cast %21 : vector<1x2x128xf32> to vector<2x128xf32>
      %23 = vector.shape_cast %20 : vector<2x128xf32> to vector<1x2x128xf32>
      tpu.vector_store %arg6[%c0_16, %c0_17, %c0_18], %23 {strides = array<i32>} : memref<1x2x128xf32, #tpu.memory_space<vmem>>, vector<1x2x128xf32>,
    } else {
    }
    return
  }
  func.func @transform_0(%arg0: i32, %arg1: i32, %arg2: i32) -> (i32, i32) {
    %c0_i32 = arith.constant 0 : i32
    return %arg0, %arg2 : i32, i32
  }
  func.func @transform_1(%arg0: i32, %arg1: i32, %arg2: i32) -> (i32, i32) {
    %c0_i32 = arith.constant 0 : i32
    return %arg2, %arg1 : i32, i32
  }
  func.func @transform_2(%arg0: i32, %arg1: i32, %arg2: i32) -> (i32, i32) {
    %c0_i32 = arith.constant 0 : i32
    return %arg0, %arg1 : i32, i32
  }
  func.func @transform_3(%arg0: i32, %arg1: i32, %arg2: i32) -> (i32, i32, i32) {
    %c0_i32 = arith.constant 0 : i32
    %c0_i32_0 = arith.constant 0 : i32
    return %arg0, %c0_i32, %arg1 : i32, i32, i32
  }
}

module attributes {stable_mosaic.version = 11 : i64} {
  func.func @_bn_relu6_kernel(%arg0: i32, %arg1: memref<512x128xbf16, #tpu.memory_space<vmem>>, %arg2: memref<1x128xf32, #tpu.memory_space<vmem>>, %arg3: memref<1x128xf32, #tpu.memory_space<vmem>>, %arg4: memref<512x128xf32, #tpu.memory_space<vmem>>) attributes {dimension_semantics = [#tpu.dimension_semantics<parallel>], iteration_bounds = array<i64: 1>, scalar_prefetch = 0 : i64, scratch_operands = 0 : i64, tpu.core_type = #tpu.core_type<tc>, window_params = [{transform_indices = @transform_0, window_bounds = array<i64: 512, 128>}, {pipeline_mode = #tpu.pipeline_mode<synchronous>, transform_indices = @transform_1, window_bounds = array<i64: 1, 128>}, {pipeline_mode = #tpu.pipeline_mode<synchronous>, transform_indices = @transform_2, window_bounds = array<i64: 1, 128>}, {transform_indices = @transform_3, window_bounds = array<i64: 512, 128>}]} {
    %c0 = arith.constant 0 : index
    %c0_0 = arith.constant 0 : index
    %0 = vector.load %arg1[%c0, %c0_0] : memref<512x128xbf16, #tpu.memory_space<vmem>>, vector<512x128xbf16>
    %1 = arith.extf %0 : vector<512x128xbf16> to vector<512x128xf32>
    %c0_1 = arith.constant 0 : index
    %c0_2 = arith.constant 0 : index
    %2 = vector.load %arg2[%c0_1, %c0_2] : memref<1x128xf32, #tpu.memory_space<vmem>>, vector<1x128xf32>
    %3 = vector.broadcast %2 : vector<1x128xf32> to vector<512x128xf32>
    %4 = arith.mulf %1, %3 : vector<512x128xf32>
    %c0_3 = arith.constant 0 : index
    %c0_4 = arith.constant 0 : index
    %5 = vector.load %arg3[%c0_3, %c0_4] : memref<1x128xf32, #tpu.memory_space<vmem>>, vector<1x128xf32>
    %6 = vector.broadcast %5 : vector<1x128xf32> to vector<512x128xf32>
    %7 = arith.addf %4, %6 : vector<512x128xf32>
    %cst = arith.constant 0.000000e+00 : f32
    %cst_5 = arith.constant 6.000000e+00 : f32
    %8 = vector.broadcast %cst : f32 to vector<512x128xf32>
    %9 = arith.maximumf %8, %7 : vector<512x128xf32>
    %10 = vector.broadcast %cst_5 : f32 to vector<512x128xf32>
    %11 = arith.minimumf %10, %9 : vector<512x128xf32>
    %c0_6 = arith.constant 0 : index
    %c0_7 = arith.constant 0 : index
    %12 = vector.load %arg4[%c0_6, %c0_7] : memref<512x128xf32, #tpu.memory_space<vmem>>, vector<512x128xf32>
    tpu.vector_store %arg4[%c0_6, %c0_7], %11 {strides = array<i32>} : memref<512x128xf32, #tpu.memory_space<vmem>>, vector<512x128xf32>,
    return
  }
  func.func @transform_0(%arg0: i32) -> (i32, i32) {
    %c0_i32 = arith.constant 0 : i32
    %c0_i32_0 = arith.constant 0 : i32
    return %arg0, %c0_i32 : i32, i32
  }
  func.func @transform_1(%arg0: i32) -> (i32, i32) {
    %c0_i32 = arith.constant 0 : i32
    %c0_i32_0 = arith.constant 0 : i32
    %c0_i32_1 = arith.constant 0 : i32
    return %c0_i32, %c0_i32_0 : i32, i32
  }
  func.func @transform_2(%arg0: i32) -> (i32, i32) {
    %c0_i32 = arith.constant 0 : i32
    %c0_i32_0 = arith.constant 0 : i32
    %c0_i32_1 = arith.constant 0 : i32
    return %c0_i32, %c0_i32_0 : i32, i32
  }
  func.func @transform_3(%arg0: i32) -> (i32, i32) {
    %c0_i32 = arith.constant 0 : i32
    %c0_i32_0 = arith.constant 0 : i32
    return %arg0, %c0_i32 : i32, i32
  }
}

</mosaic_0001>

<bundles_post_ra>
// kernel: _lambda_.3
= control target key start
LH: loop header
LB: loop body
LE: loop exit
PB: predicated region body
PF: predicated region fallthrough
CT: control target
= control target key end

     0   :  { %s1087_s0 = inlined_call_operand.vmem [shape: bf16[512,128], index: 0, kind: input, shape index: {}]   ;;  %s1088_s1 = inlined_call_operand.vmem [shape: f32[1,128], index: 1, kind: input, shape index: {}]   ;;  %s1089_s2 = inlined_call_operand.vmem [shape: f32[1,128], index: 2, kind: input, shape index: {}]   ;;  %s1090_s3 = inlined_call_operand.vmem [shape: f32[512,128], index: 3, kind: output, shape index: {}]  }
   0x1   :  { %v483_v0 = vld [vmem:[%s1087_s0] sm:$0xff]   ;;  %v610_v4 = vld [vmem:[%s1087_s0 + $0x8] sm:$0xff]   ;;  %v611_v5 = vld [vmem:[%s1087_s0 + $0x10] sm:$0xff]  }
   0x2   :  { %v667_v1 = vld [vmem:[%s1088_s1] ss:$0 sm:$0xff]  ;;  %v484_v2 = vunpack.c.l.bf16 %v483_v0  ;;  %v485_v3 = vunpack.c.h.bf16 %v483_v0  ;;  %v612_v6 = vld [vmem:[%s1087_s0 + $0x18] sm:$0xff]   ;;  %v488_v8 = vunpack.c.l.bf16 %v610_v4  ;;  %v489_v9 = vunpack.c.h.bf16 %v610_v4  ;;  %v614_v41 = vld [vmem:[%s1087_s0 + $0x28] sm:$0xff]  }
   0x3   :  { %v681_v7 = vld [vmem:[%s1089_s2] ss:$0 sm:$0xff]  ;;  %v492_v10 = vunpack.c.l.bf16 %v611_v5  ;;  %v493_v11 = vunpack.c.h.bf16 %v611_v5  ;;  %v496_v14 = vunpack.c.l.bf16 %v612_v6  ;;  %v497_v15 = vunpack.c.h.bf16 %v612_v6  ;;  %v615_v42 = vld [vmem:[%s1087_s0 + $0x30] sm:$0xff]   ;;  %v616_v47 = vld [vmem:[%s1087_s0 + $0x38] sm:$0xff]  }
   0x4   :  { %v149_v12 = vmul.f32 %v484_v2, %v667_v1  ;;  %v150_v13 = vmul.f32 %v485_v3, %v667_v1  ;;  %v151_v16 = vmul.f32 %v488_v8, %v667_v1  ;;  %v152_v17 = vmul.f32 %v489_v9, %v667_v1  ;;  %v613_v36 = vld [vmem:[%s1087_s0 + $0x20] sm:$0xff]  }
   0x5   :  { %v153_v18 = vmul.f32 %v492_v10, %v667_v1  ;;  %v154_v19 = vmul.f32 %v493_v11, %v667_v1  ;;  %v155_v22 = vmul.f32 %v496_v14, %v667_v1  ;;  %v156_v23 = vmul.f32 %v497_v15, %v667_v1 }
   0x6   :  { %v220_v20 = vadd.f32 %v681_v7, %v149_v12  ;;  %v221_v21 = vadd.f32 %v681_v7, %v150_v13  ;;  %v222_v24 = vadd.f32 %v681_v7, %v151_v16  ;;  %v223_v25 = vadd.f32 %v681_v7, %v152_v17 }
   0x7   :  { %v224_v26 = vadd.f32 %v681_v7, %v153_v18  ;;  %v225_v27 = vadd.f32 %v681_v7, %v154_v19  ;;  %v226_v30 = vadd.f32 %v681_v7, %v155_v22  ;;  %v227_v31 = vadd.f32 %v681_v7, %v156_v23  ;;  %v617_v18 = vld [vmem:[%s1087_s0 + $0x40] sm:$0xff]   ;;  %v618_v23 = vld [vmem:[%s1087_s0 + $0x48] sm:$0xff]  }
   0x8   :  { %v284_v28 = vmax.f32 %v220_v20, 0.0  ;;  %v285_v29 = vmax.f32 %v221_v21, 0.0  ;;  %v286_v32 = vmax.f32 %v222_v24, 0.0  ;;  %v287_v33 = vmax.f32 %v223_v25, 0.0  ;;  %v619_v24 = vld [vmem:[%s1087_s0 + $0x50] sm:$0xff]  }
   0x9   :  { %v288_v34 = vmax.f32 %v224_v26, 0.0  ;;  %v289_v35 = vmax.f32 %v225_v27, 0.0  ;;  %v290_v39 = vmax.f32 %v226_v30, 0.0  ;;  %v291_v40 = vmax.f32 %v227_v31, 0.0 }
   0xa   :  { %v348_v37 = vmin.f32 %v284_v28, 6.0  ;;  %v349_v38 = vmin.f32 %v285_v29, 6.0  ;;  %v350_v43 = vmin.f32 %v286_v32, 6.0  ;;  %v351_v44 = vmin.f32 %v287_v33, 6.0  ;;  %v620_v29 = vld [vmem:[%s1087_s0 + $0x58] sm:$0xff]  }
   0xb   :  { %v352_v45 = vmin.f32 %v288_v34, 6.0  ;;  %v353_v46 = vmin.f32 %v289_v35, 6.0  ;;  %v354_v48 = vmin.f32 %v290_v39, 6.0  ;;  %v355_v49 = vmin.f32 %v291_v40, 6.0 }
   0xc   :  { %412 = vst [vmem:[%s1090_s3] sm:$0xff] %v348_v37  ;;  %413 = vst [vmem:[%s1090_s3 + $0x8] sm:$0xff] %v349_v38  ;;  %v500_v50 = vunpack.c.l.bf16 %v613_v36  ;;  %v501_v51 = vunpack.c.h.bf16 %v613_v36  ;;  %v504_v52 = vunpack.c.l.bf16 %v614_v41  ;;  %v505_v53 = vunpack.c.h.bf16 %v614_v41 }
   0xd   :  { %414 = vst [vmem:[%s1090_s3 + $0x10] sm:$0xff] %v350_v43  ;;  %415 = vst [vmem:[%s1090_s3 + $0x18] sm:$0xff] %v351_v44  ;;  %v508_v54 = vunpack.c.l.bf16 %v615_v42  ;;  %v509_v55 = vunpack.c.h.bf16 %v615_v42  ;;  %v512_v58 = vunpack.c.l.bf16 %v616_v47  ;;  %v513_v59 = vunpack.c.h.bf16 %v616_v47 }
   0xe   :  { %416 = vst [vmem:[%s1090_s3 + $0x20] sm:$0xff] %v352_v45  ;;  %417 = vst [vmem:[%s1090_s3 + $0x28] sm:$0xff] %v353_v46  ;;  %v157_v56 = vmul.f32 %v500_v50, %v667_v1  ;;  %v158_v57 = vmul.f32 %v501_v51, %v667_v1  ;;  %v159_v60 = vmul.f32 %v504_v52, %v667_v1  ;;  %v516_v32 = vunpack.c.l.bf16 %v617_v18 }
   0xf   :  { %418 = vst [vmem:[%s1090_s3 + $0x30] sm:$0xff] %v354_v48  ;;  %419 = vst [vmem:[%s1090_s3 + $0x38] sm:$0xff] %v355_v49  ;;  %v160_v61 = vmul.f32 %v505_v53, %v667_v1  ;;  %v161_v62 = vmul.f32 %v508_v54, %v667_v1  ;;  %v162_v63 = vmul.f32 %v509_v55, %v667_v1  ;;  %v517_v33 = vunpack.c.h.bf16 %v617_v18 }
  0x10   :  { %v228_v0 = vadd.f32 %v681_v7, %v157_v56  ;;  %v229_v2 = vadd.f32 %v681_v7, %v158_v57  ;;  %v163_v3 = vmul.f32 %v512_v58, %v667_v1  ;;  %v164_v4 = vmul.f32 %v513_v59, %v667_v1 }
  0x11   :  { %v230_v5 = vadd.f32 %v681_v7, %v159_v60  ;;  %v231_v6 = vadd.f32 %v681_v7, %v160_v61  ;;  %v232_v8 = vadd.f32 %v681_v7, %v161_v62  ;;  %v233_v9 = vadd.f32 %v681_v7, %v162_v63  ;;  %v621_v62 = vld [vmem:[%s1087_s0 + $0x60] sm:$0xff]  }
  0x12   :  { %v292_v10 = vmax.f32 %v228_v0, 0.0  ;;  %v293_v11 = vmax.f32 %v229_v2, 0.0  ;;  %v234_v12 = vadd.f32 %v681_v7, %v163_v3  ;;  %v235_v13 = vadd.f32 %v681_v7, %v164_v4  ;;  %v622_v4 = vld [vmem:[%s1087_s0 + $0x68] sm:$0xff]  }
  0x13   :  { %v294_v14 = vmax.f32 %v230_v5, 0.0  ;;  %v295_v15 = vmax.f32 %v231_v6, 0.0  ;;  %v296_v16 = vmax.f32 %v232_v8, 0.0  ;;  %v297_v17 = vmax.f32 %v233_v9, 0.0  ;;  %v623_v5 = vld [vmem:[%s1087_s0 + $0x70] sm:$0xff]  }
  0x14   :  { %v356_v19 = vmin.f32 %v292_v10, 6.0  ;;  %v357_v20 = vmin.f32 %v293_v11, 6.0  ;;  %v298_v21 = vmax.f32 %v234_v12, 0.0  ;;  %v299_v22 = vmax.f32 %v235_v13, 0.0  ;;  %v624_v11 = vld [vmem:[%s1087_s0 + $0x78] sm:$0xff]  }
  0x15   :  { %v358_v25 = vmin.f32 %v294_v14, 6.0  ;;  %v359_v26 = vmin.f32 %v295_v15, 6.0  ;;  %v360_v27 = vmin.f32 %v296_v16, 6.0  ;;  %v361_v28 = vmin.f32 %v297_v17, 6.0 }
  0x16   :  { %420 = vst [vmem:[%s1090_s3 + $0x40] sm:$0xff] %v356_v19  ;;  %421 = vst [vmem:[%s1090_s3 + $0x48] sm:$0xff] %v357_v20  ;;  %v362_v30 = vmin.f32 %v298_v21, 6.0  ;;  %v363_v31 = vmin.f32 %v299_v22, 6.0  ;;  %v520_v34 = vunpack.c.l.bf16 %v618_v23  ;;  %v521_v35 = vunpack.c.h.bf16 %v618_v23 }
  0x17   :  { %422 = vst [vmem:[%s1090_s3 + $0x50] sm:$0xff] %v358_v25  ;;  %423 = vst [vmem:[%s1090_s3 + $0x58] sm:$0xff] %v359_v26  ;;  %v524_v36 = vunpack.c.l.bf16 %v619_v24  ;;  %v525_v37 = vunpack.c.h.bf16 %v619_v24  ;;  %v165_v38 = vmul.f32 %v516_v32, %v667_v1  ;;  %v166_v39 = vmul.f32 %v517_v33, %v667_v1 }
  0x18   :  { %424 = vst [vmem:[%s1090_s3 + $0x60] sm:$0xff] %v360_v27  ;;  %425 = vst [vmem:[%s1090_s3 + $0x68] sm:$0xff] %v361_v28  ;;  %v528_v40 = vunpack.c.l.bf16 %v620_v29  ;;  %v529_v41 = vunpack.c.h.bf16 %v620_v29  ;;  %v167_v42 = vmul.f32 %v520_v34, %v667_v1  ;;  %v168_v43 = vmul.f32 %v521_v35, %v667_v1 }
  0x19   :  { %426 = vst [vmem:[%s1090_s3 + $0x70] sm:$0xff] %v362_v30  ;;  %427 = vst [vmem:[%s1090_s3 + $0x78] sm:$0xff] %v363_v31  ;;  %v169_v44 = vmul.f32 %v524_v36, %v667_v1  ;;  %v170_v45 = vmul.f32 %v525_v37, %v667_v1  ;;  %v236_v46 = vadd.f32 %v681_v7, %v165_v38  ;;  %v532_v14 = vunpack.c.l.bf16 %v621_v62 }
  0x1a   :  { %v237_v47 = vadd.f32 %v681_v7, %v166_v39  ;;  %v171_v48 = vmul.f32 %v528_v40, %v667_v1  ;;  %v172_v49 = vmul.f32 %v529_v41, %v667_v1  ;;  %v238_v50 = vadd.f32 %v681_v7, %v167_v42 }
  0x1b   :  { %v239_v51 = vadd.f32 %v681_v7, %v168_v43  ;;  %v240_v52 = vadd.f32 %v681_v7, %v169_v44  ;;  %v241_v53 = vadd.f32 %v681_v7, %v170_v45  ;;  %v300_v54 = vmax.f32 %v236_v46, 0.0  ;;  %v625_v44 = vld [vmem:[%s1087_s0 + $0x80] sm:$0xff]  }
  0x1c   :  { %v301_v55 = vmax.f32 %v237_v47, 0.0  ;;  %v242_v56 = vadd.f32 %v681_v7, %v171_v48  ;;  %v243_v57 = vadd.f32 %v681_v7, %v172_v49  ;;  %v302_v58 = vmax.f32 %v238_v50, 0.0  ;;  %v626_v49 = vld [vmem:[%s1087_s0 + $0x88] sm:$0xff]   ;;  %v627_v50 = vld [vmem:[%s1087_s0 + $0x90] sm:$0xff]  }
  0x1d   :  { %v303_v59 = vmax.f32 %v239_v51, 0.0  ;;  %v304_v60 = vmax.f32 %v240_v52, 0.0  ;;  %v305_v61 = vmax.f32 %v241_v53, 0.0  ;;  %v364_v63 = vmin.f32 %v300_v54, 6.0 }
  0x1e   :  { %v365_v0 = vmin.f32 %v301_v55, 6.0  ;;  %v306_v2 = vmax.f32 %v242_v56, 0.0  ;;  %v307_v3 = vmax.f32 %v243_v57, 0.0  ;;  %v366_v6 = vmin.f32 %v302_v58, 6.0  ;;  %v628_v55 = vld [vmem:[%s1087_s0 + $0x98] sm:$0xff]  }
  0x1f   :  { %v367_v8 = vmin.f32 %v303_v59, 6.0  ;;  %v368_v9 = vmin.f32 %v304_v60, 6.0  ;;  %v369_v10 = vmin.f32 %v305_v61, 6.0  ;;  %428 = vst [vmem:[%s1090_s3 + $0x80] sm:$0xff] %v364_v63  ;;  %v533_v15 = vunpack.c.h.bf16 %v621_v62 }
  0x20   :  { %429 = vst [vmem:[%s1090_s3 + $0x88] sm:$0xff] %v365_v0  ;;  %v370_v12 = vmin.f32 %v306_v2, 6.0  ;;  %v371_v13 = vmin.f32 %v307_v3, 6.0  ;;  %430 = vst [vmem:[%s1090_s3 + $0x90] sm:$0xff] %v366_v6  ;;  %v536_v16 = vunpack.c.l.bf16 %v622_v4  ;;  %v537_v17 = vunpack.c.h.bf16 %v622_v4 }
  0x21   :  { %431 = vst [vmem:[%s1090_s3 + $0x98] sm:$0xff] %v367_v8  ;;  %432 = vst [vmem:[%s1090_s3 + $0xa0] sm:$0xff] %v368_v9  ;;  %v540_v18 = vunpack.c.l.bf16 %v623_v5  ;;  %v541_v19 = vunpack.c.h.bf16 %v623_v5  ;;  %v173_v20 = vmul.f32 %v532_v14, %v667_v1  ;;  %v174_v21 = vmul.f32 %v533_v15, %v667_v1 }
  0x22   :  { %433 = vst [vmem:[%s1090_s3 + $0xa8] sm:$0xff] %v369_v10  ;;  %434 = vst [vmem:[%s1090_s3 + $0xb0] sm:$0xff] %v370_v12  ;;  %v544_v22 = vunpack.c.l.bf16 %v624_v11  ;;  %v545_v23 = vunpack.c.h.bf16 %v624_v11  ;;  %v175_v24 = vmul.f32 %v536_v16, %v667_v1  ;;  %v176_v25 = vmul.f32 %v537_v17, %v667_v1 }
  0x23   :  { %435 = vst [vmem:[%s1090_s3 + $0xb8] sm:$0xff] %v371_v13  ;;  %v177_v26 = vmul.f32 %v540_v18, %v667_v1  ;;  %v178_v27 = vmul.f32 %v541_v19, %v667_v1  ;;  %v244_v28 = vadd.f32 %v681_v7, %v173_v20  ;;  %v245_v29 = vadd.f32 %v681_v7, %v174_v21 }
  0x24   :  { %v179_v30 = vmul.f32 %v544_v22, %v667_v1  ;;  %v180_v31 = vmul.f32 %v545_v23, %v667_v1  ;;  %v246_v32 = vadd.f32 %v681_v7, %v175_v24  ;;  %v247_v33 = vadd.f32 %v681_v7, %v176_v25 }
  0x25   :  { %v248_v34 = vadd.f32 %v681_v7, %v177_v26  ;;  %v249_v35 = vadd.f32 %v681_v7, %v178_v27  ;;  %v308_v36 = vmax.f32 %v244_v28, 0.0  ;;  %v309_v37 = vmax.f32 %v245_v29, 0.0  ;;  %v629_v26 = vld [vmem:[%s1087_s0 + $0xa0] sm:$0xff]  }
  0x26   :  { %v250_v38 = vadd.f32 %v681_v7, %v179_v30  ;;  %v251_v39 = vadd.f32 %v681_v7, %v180_v31  ;;  %v310_v40 = vmax.f32 %v246_v32, 0.0  ;;  %v311_v41 = vmax.f32 %v247_v33, 0.0  ;;  %v630_v31 = vld [vmem:[%s1087_s0 + $0xa8] sm:$0xff]   ;;  %v631_v32 = vld [vmem:[%s1087_s0 + $0xb0] sm:$0xff]  }
  0x27   :  { %v312_v42 = vmax.f32 %v248_v34, 0.0  ;;  %v313_v43 = vmax.f32 %v249_v35, 0.0  ;;  %v372_v45 = vmin.f32 %v308_v36, 6.0  ;;  %v373_v46 = vmin.f32 %v309_v37, 6.0  ;;  %v632_v37 = vld [vmem:[%s1087_s0 + $0xb8] sm:$0xff]  }
  0x28   :  { %v314_v47 = vmax.f32 %v250_v38, 0.0  ;;  %v315_v48 = vmax.f32 %v251_v39, 0.0  ;;  %v374_v51 = vmin.f32 %v310_v40, 6.0  ;;  %v375_v52 = vmin.f32 %v311_v41, 6.0 }
  0x29   :  { %v376_v53 = vmin.f32 %v312_v42, 6.0  ;;  %v377_v54 = vmin.f32 %v313_v43, 6.0  ;;  %436 = vst [vmem:[%s1090_s3 + $0xc0] sm:$0xff] %v372_v45  ;;  %437 = vst [vmem:[%s1090_s3 + $0xc8] sm:$0xff] %v373_v46  ;;  %v548_v58 = vunpack.c.l.bf16 %v625_v44  ;;  %v549_v59 = vunpack.c.h.bf16 %v625_v44 }
  0x2a   :  { %v378_v56 = vmin.f32 %v314_v47, 6.0  ;;  %v379_v57 = vmin.f32 %v315_v48, 6.0  ;;  %438 = vst [vmem:[%s1090_s3 + $0xd0] sm:$0xff] %v374_v51  ;;  %439 = vst [vmem:[%s1090_s3 + $0xd8] sm:$0xff] %v375_v52  ;;  %v552_v60 = vunpack.c.l.bf16 %v626_v49  ;;  %v553_v61 = vunpack.c.h.bf16 %v626_v49 }
  0x2b   :  { %440 = vst [vmem:[%s1090_s3 + $0xe0] sm:$0xff] %v376_v53  ;;  %441 = vst [vmem:[%s1090_s3 + $0xe8] sm:$0xff] %v377_v54  ;;  %v556_v62 = vunpack.c.l.bf16 %v627_v50  ;;  %v557_v63 = vunpack.c.h.bf16 %v627_v50  ;;  %v181_v0 = vmul.f32 %v548_v58, %v667_v1  ;;  %v182_v2 = vmul.f32 %v549_v59, %v667_v1 }
  0x2c   :  { %442 = vst [vmem:[%s1090_s3 + $0xf0] sm:$0xff] %v378_v56  ;;  %443 = vst [vmem:[%s1090_s3 + $0xf8] sm:$0xff] %v379_v57  ;;  %v560_v3 = vunpack.c.l.bf16 %v628_v55  ;;  %v561_v4 = vunpack.c.h.bf16 %v628_v55  ;;  %v183_v5 = vmul.f32 %v552_v60, %v667_v1  ;;  %v184_v6 = vmul.f32 %v553_v61, %v667_v1 }
  0x2d   :  { %v185_v8 = vmul.f32 %v556_v62, %v667_v1  ;;  %v186_v9 = vmul.f32 %v557_v63, %v667_v1  ;;  %v252_v10 = vadd.f32 %v681_v7, %v181_v0  ;;  %v253_v11 = vadd.f32 %v681_v7, %v182_v2 }
  0x2e   :  { %v187_v12 = vmul.f32 %v560_v3, %v667_v1  ;;  %v188_v13 = vmul.f32 %v561_v4, %v667_v1  ;;  %v254_v14 = vadd.f32 %v681_v7, %v183_v5  ;;  %v255_v15 = vadd.f32 %v681_v7, %v184_v6 }
  0x2f   :  { %v256_v16 = vadd.f32 %v681_v7, %v185_v8  ;;  %v257_v17 = vadd.f32 %v681_v7, %v186_v9  ;;  %v316_v18 = vmax.f32 %v252_v10, 0.0  ;;  %v317_v19 = vmax.f32 %v253_v11, 0.0  ;;  %v633_v8 = vld [vmem:[%s1087_s0 + $0xc0] sm:$0xff]  }
  0x30   :  { %v258_v20 = vadd.f32 %v681_v7, %v187_v12  ;;  %v259_v21 = vadd.f32 %v681_v7, %v188_v13  ;;  %v318_v22 = vmax.f32 %v254_v14, 0.0  ;;  %v319_v23 = vmax.f32 %v255_v15, 0.0  ;;  %v634_v13 = vld [vmem:[%s1087_s0 + $0xc8] sm:$0xff]   ;;  %v635_v14 = vld [vmem:[%s1087_s0 + $0xd0] sm:$0xff]  }
  0x31   :  { %v320_v24 = vmax.f32 %v256_v16, 0.0  ;;  %v321_v25 = vmax.f32 %v257_v17, 0.0  ;;  %v380_v27 = vmin.f32 %v316_v18, 6.0  ;;  %v381_v28 = vmin.f32 %v317_v19, 6.0  ;;  %v636_v19 = vld [vmem:[%s1087_s0 + $0xd8] sm:$0xff]  }
  0x32   :  { %v322_v29 = vmax.f32 %v258_v20, 0.0  ;;  %v323_v30 = vmax.f32 %v259_v21, 0.0  ;;  %v382_v33 = vmin.f32 %v318_v22, 6.0  ;;  %v383_v34 = vmin.f32 %v319_v23, 6.0 }
  0x33   :  { %v384_v35 = vmin.f32 %v320_v24, 6.0  ;;  %v385_v36 = vmin.f32 %v321_v25, 6.0  ;;  %444 = vst [vmem:[%s1090_s3 + $0x100] sm:$0xff] %v380_v27  ;;  %445 = vst [vmem:[%s1090_s3 + $0x108] sm:$0xff] %v381_v28  ;;  %v564_v40 = vunpack.c.l.bf16 %v629_v26  ;;  %v565_v41 = vunpack.c.h.bf16 %v629_v26 }
  0x34   :  { %v386_v38 = vmin.f32 %v322_v29, 6.0  ;;  %v387_v39 = vmin.f32 %v323_v30, 6.0  ;;  %446 = vst [vmem:[%s1090_s3 + $0x110] sm:$0xff] %v382_v33  ;;  %447 = vst [vmem:[%s1090_s3 + $0x118] sm:$0xff] %v383_v34  ;;  %v568_v42 = vunpack.c.l.bf16 %v630_v31  ;;  %v569_v43 = vunpack.c.h.bf16 %v630_v31 }
  0x35   :  { %448 = vst [vmem:[%s1090_s3 + $0x120] sm:$0xff] %v384_v35  ;;  %449 = vst [vmem:[%s1090_s3 + $0x128] sm:$0xff] %v385_v36  ;;  %v572_v44 = vunpack.c.l.bf16 %v631_v32  ;;  %v573_v45 = vunpack.c.h.bf16 %v631_v32  ;;  %v189_v46 = vmul.f32 %v564_v40, %v667_v1  ;;  %v190_v47 = vmul.f32 %v565_v41, %v667_v1 }
  0x36   :  { %450 = vst [vmem:[%s1090_s3 + $0x130] sm:$0xff] %v386_v38  ;;  %451 = vst [vmem:[%s1090_s3 + $0x138] sm:$0xff] %v387_v39  ;;  %v576_v48 = vunpack.c.l.bf16 %v632_v37  ;;  %v577_v49 = vunpack.c.h.bf16 %v632_v37  ;;  %v191_v50 = vmul.f32 %v568_v42, %v667_v1  ;;  %v192_v51 = vmul.f32 %v569_v43, %v667_v1 }
  0x37   :  { %v193_v52 = vmul.f32 %v572_v44, %v667_v1  ;;  %v194_v53 = vmul.f32 %v573_v45, %v667_v1  ;;  %v260_v54 = vadd.f32 %v681_v7, %v189_v46  ;;  %v261_v55 = vadd.f32 %v681_v7, %v190_v47 }
  0x38   :  { %v195_v56 = vmul.f32 %v576_v48, %v667_v1  ;;  %v196_v57 = vmul.f32 %v577_v49, %v667_v1  ;;  %v262_v58 = vadd.f32 %v681_v7, %v191_v50  ;;  %v263_v59 = vadd.f32 %v681_v7, %v192_v51 }
  0x39   :  { %v264_v60 = vadd.f32 %v681_v7, %v193_v52  ;;  %v265_v61 = vadd.f32 %v681_v7, %v194_v53  ;;  %v324_v62 = vmax.f32 %v260_v54, 0.0  ;;  %v325_v63 = vmax.f32 %v261_v55, 0.0  ;;  %v637_v52 = vld [vmem:[%s1087_s0 + $0xe0] sm:$0xff]  }
  0x3a   :  { %v266_v0 = vadd.f32 %v681_v7, %v195_v56  ;;  %v267_v2 = vadd.f32 %v681_v7, %v196_v57  ;;  %v326_v3 = vmax.f32 %v262_v58, 0.0  ;;  %v327_v4 = vmax.f32 %v263_v59, 0.0  ;;  %v638_v57 = vld [vmem:[%s1087_s0 + $0xe8] sm:$0xff]   ;;  %v639_v58 = vld [vmem:[%s1087_s0 + $0xf0] sm:$0xff]  }
  0x3b   :  { %v328_v5 = vmax.f32 %v264_v60, 0.0  ;;  %v329_v6 = vmax.f32 %v265_v61, 0.0  ;;  %v388_v9 = vmin.f32 %v324_v62, 6.0  ;;  %v389_v10 = vmin.f32 %v325_v63, 6.0  ;;  %v640_v63 = vld [vmem:[%s1087_s0 + $0xf8] sm:$0xff]  }
  0x3c   :  { %v330_v11 = vmax.f32 %v266_v0, 0.0  ;;  %v331_v12 = vmax.f32 %v267_v2, 0.0  ;;  %v390_v15 = vmin.f32 %v326_v3, 6.0  ;;  %v391_v16 = vmin.f32 %v327_v4, 6.0 }
  0x3d   :  { %v392_v17 = vmin.f32 %v328_v5, 6.0  ;;  %v393_v18 = vmin.f32 %v329_v6, 6.0  ;;  %452 = vst [vmem:[%s1090_s3 + $0x140] sm:$0xff] %v388_v9  ;;  %453 = vst [vmem:[%s1090_s3 + $0x148] sm:$0xff] %v389_v10  ;;  %v580_v22 = vunpack.c.l.bf16 %v633_v8  ;;  %v581_v23 = vunpack.c.h.bf16 %v633_v8 }
  0x3e   :  { %v394_v20 = vmin.f32 %v330_v11, 6.0  ;;  %v395_v21 = vmin.f32 %v331_v12, 6.0  ;;  %454 = vst [vmem:[%s1090_s3 + $0x150] sm:$0xff] %v390_v15  ;;  %455 = vst [vmem:[%s1090_s3 + $0x158] sm:$0xff] %v391_v16  ;;  %v584_v24 = vunpack.c.l.bf16 %v634_v13  ;;  %v585_v25 = vunpack.c.h.bf16 %v634_v13 }
  0x3f   :  { %456 = vst [vmem:[%s1090_s3 + $0x160] sm:$0xff] %v392_v17  ;;  %457 = vst [vmem:[%s1090_s3 + $0x168] sm:$0xff] %v393_v18  ;;  %v588_v26 = vunpack.c.l.bf16 %v635_v14  ;;  %v589_v27 = vunpack.c.h.bf16 %v635_v14  ;;  %v197_v28 = vmul.f32 %v580_v22, %v667_v1  ;;  %v198_v29 = vmul.f32 %v581_v23, %v667_v1 }
  0x40   :  { %458 = vst [vmem:[%s1090_s3 + $0x170] sm:$0xff] %v394_v20  ;;  %459 = vst [vmem:[%s1090_s3 + $0x178] sm:$0xff] %v395_v21  ;;  %v592_v30 = vunpack.c.l.bf16 %v636_v19  ;;  %v593_v31 = vunpack.c.h.bf16 %v636_v19  ;;  %v199_v32 = vmul.f32 %v584_v24, %v667_v1  ;;  %v200_v33 = vmul.f32 %v585_v25, %v667_v1 }
  0x41   :  { %v201_v34 = vmul.f32 %v588_v26, %v667_v1  ;;  %v202_v35 = vmul.f32 %v589_v27, %v667_v1  ;;  %v268_v36 = vadd.f32 %v681_v7, %v197_v28  ;;  %v269_v37 = vadd.f32 %v681_v7, %v198_v29 }
  0x42   :  { %v203_v38 = vmul.f32 %v592_v30, %v667_v1  ;;  %v204_v39 = vmul.f32 %v593_v31, %v667_v1  ;;  %v270_v40 = vadd.f32 %v681_v7, %v199_v32  ;;  %v271_v41 = vadd.f32 %v681_v7, %v200_v33 }
  0x43   :  { %v272_v42 = vadd.f32 %v681_v7, %v201_v34  ;;  %v273_v43 = vadd.f32 %v681_v7, %v202_v35  ;;  %v332_v44 = vmax.f32 %v268_v36, 0.0  ;;  %v333_v45 = vmax.f32 %v269_v37, 0.0 }
  0x44   :  { %v274_v46 = vadd.f32 %v681_v7, %v203_v38  ;;  %v275_v47 = vadd.f32 %v681_v7, %v204_v39  ;;  %v334_v48 = vmax.f32 %v270_v40, 0.0  ;;  %v335_v49 = vmax.f32 %v271_v41, 0.0 }
  0x45   :  { %v336_v50 = vmax.f32 %v272_v42, 0.0  ;;  %v337_v51 = vmax.f32 %v273_v43, 0.0  ;;  %v396_v53 = vmin.f32 %v332_v44, 6.0  ;;  %v397_v54 = vmin.f32 %v333_v45, 6.0 }
  0x46   :  { %v338_v55 = vmax.f32 %v274_v46, 0.0  ;;  %v339_v56 = vmax.f32 %v275_v47, 0.0  ;;  %v398_v59 = vmin.f32 %v334_v48, 6.0  ;;  %v399_v60 = vmin.f32 %v335_v49, 6.0 }
  0x47   :  { %v400_v61 = vmin.f32 %v336_v50, 6.0  ;;  %v401_v62 = vmin.f32 %v337_v51, 6.0  ;;  %460 = vst [vmem:[%s1090_s3 + $0x180] sm:$0xff] %v396_v53  ;;  %461 = vst [vmem:[%s1090_s3 + $0x188] sm:$0xff] %v397_v54  ;;  %v596_v3 = vunpack.c.l.bf16 %v637_v52  ;;  %v597_v4 = vunpack.c.h.bf16 %v637_v52 }
  0x48   :  { %v402_v0 = vmin.f32 %v338_v55, 6.0  ;;  %v403_v2 = vmin.f32 %v339_v56, 6.0  ;;  %462 = vst [vmem:[%s1090_s3 + $0x190] sm:$0xff] %v398_v59  ;;  %463 = vst [vmem:[%s1090_s3 + $0x198] sm:$0xff] %v399_v60  ;;  %v600_v5 = vunpack.c.l.bf16 %v638_v57  ;;  %v601_v6 = vunpack.c.h.bf16 %v638_v57 }
  0x49   :  { %464 = vst [vmem:[%s1090_s3 + $0x1a0] sm:$0xff] %v400_v61  ;;  %465 = vst [vmem:[%s1090_s3 + $0x1a8] sm:$0xff] %v401_v62  ;;  %v604_v8 = vunpack.c.l.bf16 %v639_v58  ;;  %v605_v9 = vunpack.c.h.bf16 %v639_v58  ;;  %v205_v10 = vmul.f32 %v596_v3, %v667_v1  ;;  %v206_v11 = vmul.f32 %v597_v4, %v667_v1 }
  0x4a   :  { %466 = vst [vmem:[%s1090_s3 + $0x1b0] sm:$0xff] %v402_v0  ;;  %467 = vst [vmem:[%s1090_s3 + $0x1b8] sm:$0xff] %v403_v2  ;;  %v608_v12 = vunpack.c.l.bf16 %v640_v63  ;;  %v609_v13 = vunpack.c.h.bf16 %v640_v63  ;;  %v207_v14 = vmul.f32 %v600_v5, %v667_v1  ;;  %v208_v15 = vmul.f32 %v601_v6, %v667_v1 }
  0x4b   :  { %v209_v16 = vmul.f32 %v604_v8, %v667_v1  ;;  %v210_v17 = vmul.f32 %v605_v9, %v667_v1  ;;  %v276_v18 = vadd.f32 %v681_v7, %v205_v10  ;;  %v277_v19 = vadd.f32 %v681_v7, %v206_v11 }
  0x4c   :  { %v211_v20 = vmul.f32 %v608_v12, %v667_v1  ;;  %v212_v21 = vmul.f32 %v609_v13, %v667_v1  ;;  %v278_v22 = vadd.f32 %v681_v7, %v207_v14  ;;  %v279_v23 = vadd.f32 %v681_v7, %v208_v15 }
  0x4d   :  { %v280_v24 = vadd.f32 %v681_v7, %v209_v16  ;;  %v281_v25 = vadd.f32 %v681_v7, %v210_v17  ;;  %v340_v26 = vmax.f32 %v276_v18, 0.0  ;;  %v341_v27 = vmax.f32 %v277_v19, 0.0 }
  0x4e   :  { %v282_v28 = vadd.f32 %v681_v7, %v211_v20  ;;  %v283_v29 = vadd.f32 %v681_v7, %v212_v21  ;;  %v342_v30 = vmax.f32 %v278_v22, 0.0  ;;  %v343_v31 = vmax.f32 %v279_v23, 0.0 }
  0x4f   :  { %v344_v32 = vmax.f32 %v280_v24, 0.0  ;;  %v345_v33 = vmax.f32 %v281_v25, 0.0  ;;  %v404_v34 = vmin.f32 %v340_v26, 6.0  ;;  %v405_v1 = vmin.f32 %v341_v27, 6.0 }
  0x50   :  { %v346_v35 = vmax.f32 %v282_v28, 0.0  ;;  %v347_v36 = vmax.f32 %v283_v29, 0.0  ;;  %v406_v37 = vmin.f32 %v342_v30, 6.0  ;;  %v407_v38 = vmin.f32 %v343_v31, 6.0 }
  0x51   :  { %v408_v39 = vmin.f32 %v344_v32, 6.0  ;;  %v409_v40 = vmin.f32 %v345_v33, 6.0  ;;  %468 = vst [vmem:[%s1090_s3 + $0x1c0] sm:$0xff] %v404_v34  ;;  %469 = vst [vmem:[%s1090_s3 + $0x1c8] sm:$0xff] %v405_v1 }
  0x52   :  { %v410_v7 = vmin.f32 %v346_v35, 6.0  ;;  %v411_v41 = vmin.f32 %v347_v36, 6.0  ;;  %470 = vst [vmem:[%s1090_s3 + $0x1d0] sm:$0xff] %v406_v37  ;;  %471 = vst [vmem:[%s1090_s3 + $0x1d8] sm:$0xff] %v407_v38 }
  0x53   :  { %472 = vst [vmem:[%s1090_s3 + $0x1e0] sm:$0xff] %v408_v39  ;;  %473 = vst [vmem:[%s1090_s3 + $0x1e8] sm:$0xff] %v409_v40 }
  0x54   :  { %474 = vst [vmem:[%s1090_s3 + $0x1f0] sm:$0xff] %v410_v7  ;;  %475 = vst [vmem:[%s1090_s3 + $0x1f8] sm:$0xff] %v411_v41 }

// kernel: _lambda_.2
= control target key start
LH: loop header
LB: loop body
LE: loop exit
PB: predicated region body
PF: predicated region fallthrough
CT: control target
= control target key end

     0   :  { %s1114_s12 = smov 0   ;;  %s1116_s13 = smov 0   ;;  %s1206_s0 = inlined_call_operand.vmem [shape: bf16[512,128], index: 0, kind: input, shape index: {}]   ;;  %s1207_s1 = inlined_call_operand.vmem [shape: bf16[128,128], index: 1, kind: input, shape index: {}]   ;;  %s1208_s2 = inlined_call_operand.vmem [shape: bf16[512,128], index: 2, kind: output, shape index: {0}]   ;;  %s1209_s3 = inlined_call_operand.vmem [shape: f32[4,2,128], index: 3, kind: output, shape index: {1}]  }
   0x1   :  { %s1118_s14 = smov 0  }
   0x2 LB: > { %s33_s15 = sadd.s32 1, %s1088_s13  ;;  %p863_p0 = scmp.ge.s32.totalorder %s1092_s14, 1  ;;  %s1092_s14 = sphi %s1118_s14, %s14_s14   ;;  %s1088_s13 = sphi %s1116_s13, %s1211_s13   ;;  %s1084_s12 = sphi %s1114_s12, %s1210_s12  }
   0x3   : > { %p35_p1 = scmp.ge.s32.totalorder %s33_s15, 4  ;;  %p185_p2 = scmp.lt.s32.totalorder %s1092_s14, 5 }
   0x5   : > { %s1213_s15 = smov (%p35_p1, %s33_s15), 0  ;;  %p186_p3 = pnand %p863_p0, %p185_p2 }
   0x6   : > { %v1054_v0 = vld [vmem:[%s1207_s1] sm:$0xff] (!%p186_p3)   ;;  %s864_s18 = sshll.u32 (!%p186_p3), %s1084_s12, 4  ;;  %v1055_v1 = vld [vmem:[%s1207_s1 + $0x8] sm:$0xff] (!%p186_p3)   ;;  %v1056_v2 = vld [vmem:[%s1207_s1 + $0x10] sm:$0xff] (!%p186_p3)   ;;  %p257_p5 = scmp.lt.s32.totalorder (!%p186_p3), %s1084_s12, 3  ;;  %vm715_vm0 = vcmask (!%p186_p3), 1040384  }
   0x7   : > { %189 = sbr.rel (%p186_p3) target bundleno = 300 (0x12c), region = 28  ;;  %p231_p4 = scmp.lt.s32.totalorder (!%p186_p3), %s864_s18, 63  ;;  %982 = vmatprep.subr.bf16.mxu0 (!%p186_p3), %v1054_v0  ;;  %1014 = vmatprep.subr.bf16.mxu1 (!%p186_p3), %v1054_v0  ;;  %v1057_v3 = vld [vmem:[%s1207_s1 + $0x18] sm:$0xff] (!%p186_p3)   ;;  %v1058_v5 = vld [vmem:[%s1207_s1 + $0x20] sm:$0xff] (!%p186_p3)   ;;  %v1059_v7 = vld [vmem:[%s1207_s1 + $0x28] sm:$0xff] (!%p186_p3)  }
   0x8   : > { %983 = vmatpush3.bf16.msra.mxu0 (!%p186_p3), %v1054_v0  ;;  %1022 = vmatpush3.bf16.msra.mxu1 (!%p186_p3), %v1054_v0  ;;  %v1060_v8 = vld [vmem:[%s1207_s1 + $0x30] sm:$0xff] (!%p186_p3)   ;;  %v1061_v9 = vld [vmem:[%s1207_s1 + $0x38] sm:$0xff] (!%p186_p3)  }
   0x9   : > { %984 = vmatprep.subr.bf16.mxu0 (!%p186_p3), %v1055_v1  ;;  %1015 = vmatprep.subr.bf16.mxu1 (!%p186_p3), %v1055_v1 }
   0xc   : > { %985 = vmatpush3.bf16.msra.mxu0 (!%p186_p3), %v1055_v1  ;;  %1023 = vmatpush3.bf16.msra.mxu1 (!%p186_p3), %v1055_v1 }
   0xd   : > { %986 = vmatprep.subr.bf16.mxu0 (!%p186_p3), %v1056_v2  ;;  %1016 = vmatprep.subr.bf16.mxu1 (!%p186_p3), %v1056_v2 }
   0xe   : > { %s1215_s18 = smov (!%p231_p4, %s864_s18), 63  ;;  %s1217_s12 = smov (!%p257_p5, %s1084_s12), 3 }
   0xf   : > { %s865_s23 = sshll.u32 %s1215_s18, 2  ;;  %s868_s17 = sshll.u32 %s1217_s12, 1 }
  0x10   : > { %s1152_s26 = scalar_lea.vmem %s1206_s0, %s865_s23  ;;  %987 = vmatpush3.bf16.msra.mxu0 %v1056_v2  ;;  %1024 = vmatpush3.bf16.msra.mxu1 %v1056_v2  ;;  %s1182_s16 = scalar_lea.vmem %s1208_s2, %s865_s23 }
  0x11   : > { %v1062_v4 = vld [vmem:[%s1152_s26] sm:$0xff]   ;;  %988 = vmatprep.subr.bf16.mxu0 %v1057_v3  ;;  %1017 = vmatprep.subr.bf16.mxu1 %v1057_v3  ;;  %v1063_v10 = vld [vmem:[%s1152_s26 + $0x8] sm:$0xff]   ;;  %v1064_v12 = vld [vmem:[%s1152_s26 + $0x10] sm:$0xff]   ;;  %s263_s20 = scalar_lea.vmem %s1209_s3, %s868_s17 }
  0x12   : > { %998 = vmatprep.mubr.bf16.mxu0 %v1062_v4  ;;  %v1066_v6 = vld [vmem:[%s1152_s26 + $0x20] sm:$0xff]   ;;  %v1067_v11 = vld [vmem:[%s1152_s26 + $0x28] sm:$0xff]   ;;  %v1068_v13 = vld [vmem:[%s1152_s26 + $0x30] sm:$0xff]  }
  0x13   : > { %1006 = vmatprep.mubr.bf16.mxu1 %v1066_v6  ;;  %v1065_v14 = vld [vmem:[%s1152_s26 + $0x18] sm:$0xff]  }
  0x14   : > { %989 = vmatpush3.bf16.msra.mxu0 %v1057_v3  ;;  %1025 = vmatpush3.bf16.msra.mxu1 %v1057_v3  ;;  %v1069_v15 = vld [vmem:[%s1152_s26 + $0x38] sm:$0xff]  }
  0x15   : > { %990 = vmatprep.subr.bf16.mxu0 %v1058_v5  ;;  %1018 = vmatprep.subr.bf16.mxu1 %v1058_v5 }
  0x18   : > { %991 = vmatpush3.bf16.msra.mxu0 %v1058_v5  ;;  %1026 = vmatpush3.bf16.msra.mxu1 %v1058_v5 }
  0x19   : > { %992 = vmatprep.subr.bf16.mxu0 %v1059_v7  ;;  %1019 = vmatprep.subr.bf16.mxu1 %v1059_v7 }
  0x1c   : > { %993 = vmatpush3.bf16.msra.mxu0 %v1059_v7  ;;  %1027 = vmatpush3.bf16.msra.mxu1 %v1059_v7 }
  0x1d   : > { %994 = vmatprep.subr.bf16.mxu0 %v1060_v8  ;;  %1020 = vmatprep.subr.bf16.mxu1 %v1060_v8 }
  0x20   : > { %995 = vmatpush3.bf16.msra.mxu0 %v1060_v8  ;;  %1028 = vmatpush3.bf16.msra.mxu1 %v1060_v8 }
  0x21   : > { %996 = vmatprep.subr.bf16.mxu0 %v1061_v9  ;;  %1021 = vmatprep.subr.bf16.mxu1 %v1061_v9 }
  0x24   : > { %997 = vmatpush3.bf16.msra.mxu0 %v1061_v9  ;;  %1029 = vmatpush3.bf16.msra.mxu1 %v1061_v9 }
  0x27   : > { %999 = vmatmul.mubr.bf16.vlgmr.msra.gmra.mrb[0].mxu0 %v1063_v10  ;;  %1007 = vmatmul.mubr.bf16.vlgmr.msra.gmra.mrb[0].mxu1 %v1067_v11 }
  0x28   : > { %1002 = vmatprep.mubr.bf16.mxu0 %v1064_v12  ;;  %1010 = vmatprep.mubr.bf16.mxu1 %v1068_v13 }
  0x2f   : > { %1003 = vmatmul.mubr.bf16.gmra.mrb[4].mxu0 %v1065_v14  ;;  %1011 = vmatmul.mubr.bf16.gmra.mrb[4].mxu1 %v1069_v15 }
  0xfa   : > { %v1000_v16 = vpop.f32.mrb[0].mxu0  ;;  %v1008_v17 = vpop.f32.mrb[0].mxu1 }
  0xfb   : > { %v463_v18 = vpop.f32.mrb[1].mxu0  ;;  %v495_v19 = vpop.f32.mrb[1].mxu1  ;;  %v680_v31 = vmul.f32 %v1000_v16, %v1000_v16  ;;  %v688_v3 = vmul.f32 %v1008_v17, %v1008_v17 }
  0xfc   : > { %v1001_v20 = vpop.f32.mrb[2].mxu0  ;;  %v1009_v21 = vpop.f32.mrb[2].mxu1  ;;  %v678_v22 = vmul.f32 %v463_v18, %v463_v18  ;;  %v686_v61 = vmul.f32 %v495_v19, %v495_v19 }
  0xfd   : > { %v927_v23 = vpack.c.bf16 %v1001_v20, %v1000_v16  ;;  %v466_v24 = vpop.f32.mrb[3].mxu0  ;;  %v947_v25 = vpack.c.bf16 %v1009_v21, %v1008_v17  ;;  %v498_v26 = vpop.f32.mrb[3].mxu1  ;;  %v681_v34 = vmul.f32 %v1001_v20, %v1001_v20  ;;  %v689_v6 = vmul.f32 %v1009_v21, %v1009_v21 }
  0xfe   : > { %v922_v27 = vpack.c.bf16 %v466_v24, %v463_v18  ;;  %v657_v28 = vadd.f32 %v466_v24, %v463_v18  ;;  %v679_v29 = vmul.f32 %v466_v24, %v466_v24  ;;  %v942_v30 = vpack.c.bf16 %v498_v26, %v495_v19 }
  0xff   : > { %959 = vst [vmem:[%s1182_s16 + $0x8] sm:$0xff] %v927_v23   ;;  %963 = vst [vmem:[%s1182_s16 + $0x28] sm:$0xff] %v947_v25   ;;  %v687_v2 = vmul.f32 %v498_v26, %v498_v26 }
 0x100   : > { %923 = vst [vmem:[%s1182_s16] sm:$0xff] %v922_v27   ;;  %v658_v32 = vadd.f32 %v1000_v16, %v657_v28  ;;  %v694_v33 = vadd.f32 %v679_v29, %v678_v22  ;;  %962 = vst [vmem:[%s1182_s16 + $0x20] sm:$0xff] %v942_v30  }
 0x102   : > { %v695_v35 = vadd.f32 %v694_v33, %v680_v31  ;;  %v1004_v36 = vpop.f32.mrb[4].mxu0  ;;  %v659_v37 = vadd.f32 %v1001_v20, %v658_v32  ;;  %v1012_v38 = vpop.f32.mrb[4].mxu1 }
 0x103   : > { %v479_v39 = vpop.f32.mrb[5].mxu0  ;;  %v511_v40 = vpop.f32.mrb[5].mxu1  ;;  %v684_v55 = vmul.f32 %v1004_v36, %v1004_v36  ;;  %v692_v15 = vmul.f32 %v1012_v38, %v1012_v38 }
 0x104   : > { %v660_v41 = vadd.f32 %v659_v37, %v479_v39  ;;  %v682_v42 = vmul.f32 %v479_v39, %v479_v39  ;;  %v696_v43 = vadd.f32 %v695_v35, %v681_v34  ;;  %v1005_v44 = vpop.f32.mrb[6].mxu0  ;;  %v1013_v45 = vpop.f32.mrb[6].mxu1  ;;  %v690_v9 = vmul.f32 %v511_v40, %v511_v40 }
 0x105   : > { %v937_v46 = vpack.c.bf16 %v1005_v44, %v1004_v36  ;;  %v482_v47 = vpop.f32.mrb[7].mxu0  ;;  %v957_v48 = vpack.c.bf16 %v1013_v45, %v1012_v38  ;;  %v514_v49 = vpop.f32.mrb[7].mxu1  ;;  %v685_v58 = vmul.f32 %v1005_v44, %v1005_v44 }
 0x106   : > { %v697_v50 = vadd.f32 %v696_v43, %v682_v42  ;;  %v932_v51 = vpack.c.bf16 %v482_v47, %v479_v39  ;;  %v661_v52 = vadd.f32 %v660_v41, %v482_v47  ;;  %v683_v53 = vmul.f32 %v482_v47, %v482_v47 }
 0x107   : > { %961 = vst [vmem:[%s1182_s16 + $0x18] sm:$0xff] %v937_v46   ;;  %965 = vst [vmem:[%s1182_s16 + $0x38] sm:$0xff] %v957_v48   ;;  %v952_v54 = vpack.c.bf16 %v514_v49, %v511_v40  ;;  %v691_v14 = vmul.f32 %v514_v49, %v514_v49 }
 0x108   : > { %960 = vst [vmem:[%s1182_s16 + $0x10] sm:$0xff] %v932_v51   ;;  %v662_v56 = vadd.f32 %v1004_v36, %v661_v52  ;;  %v698_v57 = vadd.f32 %v697_v50, %v683_v53 }
 0x109   : > { %964 = vst [vmem:[%s1182_s16 + $0x30] sm:$0xff] %v952_v54  }
 0x10a   : > { %v699_v59 = vadd.f32 %v698_v57, %v684_v55  ;;  %v663_v60 = vadd.f32 %v1005_v44, %v662_v56 }
 0x10c   : > { %v664_v62 = vadd.f32 %v663_v60, %v495_v19  ;;  %v700_v63 = vadd.f32 %v699_v59, %v685_v58  ;;  %v693_v19 = vmul.f32 %v1013_v45, %v1013_v45 }
 0x10e   : > { %v701_v0 = vadd.f32 %v700_v63, %v686_v61  ;;  %v665_v1 = vadd.f32 %v664_v62, %v498_v26 }
 0x110   : > { %v666_v4 = vadd.f32 %v1008_v17, %v665_v1  ;;  %v702_v5 = vadd.f32 %v701_v0, %v687_v2 }
 0x112   : > { %v703_v7 = vadd.f32 %v702_v5, %v688_v3  ;;  %v667_v8 = vadd.f32 %v1009_v21, %v666_v4 }
 0x114   : > { %v668_v10 = vadd.f32 %v667_v8, %v511_v40  ;;  %v704_v11 = vadd.f32 %v703_v7, %v689_v6 }
 0x116   : > { %v705_v12 = vadd.f32 %v704_v11, %v690_v9  ;;  %v669_v13 = vadd.f32 %v668_v10, %v514_v49 }
 0x118   : > { %v670_v16 = vadd.f32 %v1012_v38, %v669_v13  ;;  %v706_v18 = vadd.f32 %v705_v12, %v691_v14 }
 0x11a   : > { %v671_v20 = vadd.f32 %v1013_v45, %v670_v16  ;;  %v707_v22 = vadd.f32 %v706_v18, %v692_v15 }
 0x11c   : > { %v672_v23 = vrot.slane %v671_v20, 4  ;;  %v708_v17 = vadd.f32 %v707_v22, %v693_v19 }
 0x11e   : > { %v673_v24 = vadd.f32 %v672_v23, %v671_v20  ;;  %v709_v25 = vrot.slane %v708_v17, 4 }
 0x120   : > { %v674_v26 = vrot.slane %v673_v24, 2  ;;  %v710_v21 = vadd.f32 %v709_v25, %v708_v17 }
 0x122   : > { %v675_v27 = vadd.f32 %v674_v26, %v673_v24  ;;  %v711_v28 = vrot.slane %v710_v21, 2 }
 0x124   : > { %v676_v29 = vrot.slane %v675_v27, 1  ;;  %v712_v30 = vadd.f32 %v711_v28, %v710_v21 }
 0x126   : > { %v713_v31 = vrot.slane %v712_v30, 1  ;;  %v677_v32 = vadd.f32 %v676_v29, %v675_v27 }
 0x128   : > { %v714_v33 = vadd.f32 %v713_v31, %v712_v30 }
 0x12a   : > { %v716_v34 = vsel %vm715_vm0, %v677_v32, %v714_v33 }
 0x12b   : > { %717 = vst [vmem:[%s263_s20] sm:$0x3] %v716_v34 }
 0x12c PF: > { %s14_s14 = sadd.s32 1, %s1092_s14   ;;  %s1210_s12 = smov %s1088_s13 }
 0x12d   : > { %p11_p6 = scmp.ge.s32.totalorder %s14_s14, 6   ;;  %s1211_s13 = smov %s1213_s15 }
 0x12f   :  { %13 = sbr.rel (!%p11_p6) target bundleno = 2 (0x2), region = 81 }

</bundles_post_ra>
